<compile_context>
chip_gen: v5e
topology: v5e:2x2
jax: 0.10.0
libtpu: 0.0.40
codegen_flags: <defaults>
</compile_context>

<pallas_src>
import functools

import jax
import jax.numpy as jnp
from jax.experimental import pallas as pl
from jax.experimental.pallas import tpu as pltpu

EPS = 1e-5


def _residual_block_kernel(x_ref, mask_ref, seg_ref, segt_ref,
                           w1_ref, g1_ref, b1_ref,
                           w2_ref, g2_ref, b2_ref,
                           o_ref, *, W, conv_dtype):
    # x_ref / o_ref block: [1, C, L]  (L = NG*HW; NG samples concatenated on
    #                                  the lane axis, HW = H*W per sample)
    # mask_ref:            [9, L]     1.0 inside the image, 0.0 at the halo
    # seg_ref:             [L, NG]    per-sample lane-segment indicator
    # segt_ref:            [NG, L]    its transpose (broadcast-back operand)
    # w{1,2}_ref:          [Cout, 9*Cin]   (conv_dtype)
    # g/b refs:            [C, 1]
    _, C, L = x_ref.shape
    NG = seg_ref.shape[1]
    HW = L // NG
    x = x_ref[0]                                            # [C, L] f32
    seg = seg_ref[...]                                      # [L, NG]
    segt = segt_ref[...]                                    # [NG, L]

    def conv3x3(inp, w_ref):
        # im2col kept in registers: 9 shifted copies of the input (static lane
        # rolls, out-of-image pixels zeroed) concatenated along the sublane
        # axis, then a single MXU matmul with K = 9*Cin.
        taps = []
        for k in range(9):
            dy, dx = k // 3 - 1, k % 3 - 1
            s = dy * W + dx                                 # flat-index shift
            if s == 0:
                tap = inp                                   # center tap
            else:
                tap = (pltpu.roll(inp, shift=(-s) % L, axis=1)
                       * mask_ref[k:k + 1, :])
            taps.append(tap.astype(conv_dtype))
        xcol = jnp.concatenate(taps, axis=0)                # [9*Cin, L]
        return jnp.dot(w_ref[...], xcol,
                       preferred_element_type=jnp.float32)  # [Cout, L] f32

    def instance_norm(y, g_ref, b_ref):
        # Per-sample statistics via MXU segment sums (keeps the XLU free for
        # the conv rolls); math stays f32.
        inv_hw = 1.0 / HW
        s1 = jnp.dot(y, seg, preferred_element_type=jnp.float32)        # [C, NG]
        s2 = jnp.dot(y * y, seg, preferred_element_type=jnp.float32)    # [C, NG]
        mean = s1 * inv_hw
        var = jnp.maximum(s2 * inv_hw - mean * mean, 0.0)                # biased var
        scale = g_ref[...] * jax.lax.rsqrt(var + EPS)                    # [C, NG]
        shift = b_ref[...] - mean * scale                                # [C, NG]
        if NG == 1:
            # [C, 1] broadcasts directly over the lane axis.
            return y * scale + shift
        # Broadcast each sample's scale/shift across its lane segment (MXU).
        return (y * jnp.dot(scale, segt, preferred_element_type=jnp.float32)
                + jnp.dot(shift, segt, preferred_element_type=jnp.float32))

    h = conv3x3(x, w1_ref)
    h = instance_norm(h, g1_ref, b1_ref)
    h = jnp.maximum(h, 0.0)                                 # ReLU
    h = conv3x3(h, w2_ref)
    h = instance_norm(h, g2_ref, b2_ref)
    o_ref[0] = x + h                                        # residual add


def residual_block(x_nchw, params, *, num_groups=None, conv_dtype=jnp.float32):
    """x_nchw: [N, C, H, W] float32 (PyTorch convention). Returns NCHW.

    num_groups: number of grid steps.  Samples are split into `num_groups`
      groups; each group's samples are concatenated along the lane axis.
      Use 1 on single-TC chips (v5e/v6e); the default min(N, 2) keeps both
      v7x TensorCores busy.
    conv_dtype: dtype of the conv matmul operands (weights + im2col taps).
      jnp.bfloat16 doubles MXU throughput on v6e/v7x; accumulation is f32.
    """
    w1, g1, b1, w2, g2, b2 = params
    N, C, H, W = x_nchw.shape
    HW = H * W

    if num_groups is None:
        num_groups = min(N, 2)
    assert N % num_groups == 0, (N, num_groups)
    NG = N // num_groups                 # samples folded per grid step
    L = NG * HW                          # lane axis width per step

    # [N,C,H,W] -> [G, C, NG*HW]: each group's samples concatenated on lanes.
    x = (x_nchw.astype(jnp.float32)
         .reshape(num_groups, NG, C, HW)
         .transpose(0, 2, 1, 3)
         .reshape(num_groups, C, L))

    def fold_weight(w):
        # OIHW [Cout, Cin, 3, 3] -> [Cout, (ky*3+kx)*Cin + ci] = [Cout, 9*Cin]
        co, ci = w.shape[0], w.shape[1]
        return (jnp.transpose(w, (0, 2, 3, 1))
                .reshape(co, 9 * ci).astype(conv_dtype))

    w1t, w2t = fold_weight(w1), fold_weight(w2)
    g1r = g1.reshape(C, 1).astype(jnp.float32)
    b1r = b1.reshape(C, 1).astype(jnp.float32)
    g2r = g2.reshape(C, 1).astype(jnp.float32)
    b2r = b2.reshape(C, 1).astype(jnp.float32)

    # Per-tap validity masks over the flattened spatial index (built once; the
    # roll-based im2col shifts never cross a sample segment for valid pixels,
    # so tiling the per-sample mask over the NG segments is exact).
    yy = jnp.repeat(jnp.arange(H, dtype=jnp.int32), W)      # [HW] row index
    xx = jnp.tile(jnp.arange(W, dtype=jnp.int32), H)        # [HW] col index
    masks = []
    for k in range(9):
        dy, dx = k // 3 - 1, k % 3 - 1
        m = ((yy + dy >= 0) & (yy + dy < H) & (xx + dx >= 0) & (xx + dx < W))
        masks.append(m)
    masks = jnp.stack(masks, axis=0).astype(jnp.float32)    # [9, HW]
    masks = jnp.tile(masks, (1, NG))                        # [9, L]

    # Per-sample lane-segment indicator for MXU segment sums / broadcast-back.
    lane_sample = jnp.repeat(jnp.arange(NG, dtype=jnp.int32), HW)        # [L]
    seg = (lane_sample[:, None] ==
           jnp.arange(NG, dtype=jnp.int32)[None, :]).astype(jnp.float32)  # [L, NG]
    segt = seg.T                                                          # [NG, L]

    kernel = functools.partial(_residual_block_kernel, W=W,
                               conv_dtype=conv_dtype)

    def full(shape):
        zeros = (0,) * len(shape)
        return pl.BlockSpec(shape, lambda g, _z=zeros: _z)

    out = pl.pallas_call(
        kernel,
        out_shape=jax.ShapeDtypeStruct((num_groups, C, L), jnp.float32),
        grid_spec=pltpu.PrefetchScalarGridSpec(
            num_scalar_prefetch=0,
            grid=(num_groups,),
            in_specs=[
                pl.BlockSpec((1, C, L), lambda g: (g, 0, 0)),
                full((9, L)),
                full((L, NG)),
                full((NG, L)),
                full((C, 9 * C)), full((C, 1)), full((C, 1)),
                full((C, 9 * C)), full((C, 1)), full((C, 1)),
            ],
            out_specs=pl.BlockSpec((1, C, L), lambda g: (g, 0, 0)),
        ),
        compiler_params=pltpu.CompilerParams(
            dimension_semantics=("parallel",)),   # groups feed both v7x TCs
    )(x, masks, seg, segt, w1t, g1r, b1r, w2t, g2r, b2r)

    return (out.reshape(num_groups, C, NG, HW)
            .transpose(0, 2, 1, 3)
            .reshape(N, C, H, W))


def reference(x_nchw, params):
    """Pure-JAX reference matching the PyTorch forward (NCHW)."""
    w1, g1, b1, w2, g2, b2 = params

    def conv(x, w):
        return jax.lax.conv_general_dilated(
            x, w, window_strides=(1, 1), padding=((1, 1), (1, 1)),
            dimension_numbers=("NCHW", "OIHW", "NCHW"))

    def inorm(x, g, b):
        mean = jnp.mean(x, axis=(2, 3), keepdims=True)
        var = jnp.mean((x - mean) ** 2, axis=(2, 3), keepdims=True)
        return ((x - mean) * jax.lax.rsqrt(var + EPS)
                * g[None, :, None, None] + b[None, :, None, None])

    h = conv(x_nchw, w1)
    h = inorm(h, g1, b1)
    h = jnp.maximum(h, 0.0)
    h = conv(h, w2)
    h = inorm(h, g2, b2)
    return x_nchw + h


if __name__ == "__main__":
    key = jax.random.PRNGKey(0)
    N, C, H, W = 2, 4, 16, 16          # dim_in == dim_out == C (residual add)
    ks = jax.random.split(key, 7)
    x = jax.random.normal(ks[0], (N, C, H, W), jnp.float32)
    w1 = jax.random.normal(ks[1], (C, C, 3, 3), jnp.float32) * 0.1
    w2 = jax.random.normal(ks[2], (C, C, 3, 3), jnp.float32) * 0.1
    g1 = 1.0 + 0.1 * jax.random.normal(ks[3], (C,), jnp.float32)
    b1 = 0.1 * jax.random.normal(ks[4], (C,), jnp.float32)
    g2 = 1.0 + 0.1 * jax.random.normal(ks[5], (C,), jnp.float32)
    b2 = 0.1 * jax.random.normal(ks[6], (C,), jnp.float32)
    params = (w1, g1, b1, w2, g2, b2)

    ref = jax.block_until_ready(reference(x, params))

    # Default grouping (2 grid steps -> both v7x TCs; 1 sample per step here).
    out = jax.block_until_ready(residual_block(x, params))
    assert out.shape == x.shape, (out.shape, x.shape)
    err = float(jnp.max(jnp.abs(out - ref)))
    assert jnp.allclose(out, ref, atol=1e-4, rtol=1e-4), err

    # Fully folded batch (1 grid step, v5e/v6e setting) exercises the
    # multi-sample segment-sum / broadcast-back path.
    out1 = jax.block_until_ready(residual_block(x, params, num_groups=1))
    err1 = float(jnp.max(jnp.abs(out1 - ref)))
    assert jnp.allclose(out1, ref, atol=1e-4, rtol=1e-4), err1

    print("KERNEL_OK")
</pallas_src>

<mosaic_0001>
module attributes {stable_mosaic.version = 11 : i64} {
  func.func @_residual_block_kernel(%arg0: i32, %arg1: memref<1x4x256xf32, #tpu.memory_space<vmem>>, %arg2: memref<9x256xf32, #tpu.memory_space<vmem>>, %arg3: memref<256x1xf32, #tpu.memory_space<vmem>>, %arg4: memref<1x256xf32, #tpu.memory_space<vmem>>, %arg5: memref<4x36xf32, #tpu.memory_space<vmem>>, %arg6: memref<4x1xf32, #tpu.memory_space<vmem>>, %arg7: memref<4x1xf32, #tpu.memory_space<vmem>>, %arg8: memref<4x36xf32, #tpu.memory_space<vmem>>, %arg9: memref<4x1xf32, #tpu.memory_space<vmem>>, %arg10: memref<4x1xf32, #tpu.memory_space<vmem>>, %arg11: memref<1x4x256xf32, #tpu.memory_space<vmem>>) attributes {dimension_semantics = [#tpu.dimension_semantics<parallel>], iteration_bounds = array<i64: 2>, scalar_prefetch = 0 : i64, scratch_operands = 0 : i64, tpu.core_type = #tpu.core_type<tc>, window_params = [{transform_indices = @transform_0, window_bounds = array<i64: 1, 4, 256>}, {pipeline_mode = #tpu.pipeline_mode<synchronous>, transform_indices = @transform_1, window_bounds = array<i64: 9, 256>}, {pipeline_mode = #tpu.pipeline_mode<synchronous>, transform_indices = @transform_2, window_bounds = array<i64: 256, 1>}, {pipeline_mode = #tpu.pipeline_mode<synchronous>, transform_indices = @transform_3, window_bounds = array<i64: 1, 256>}, {pipeline_mode = #tpu.pipeline_mode<synchronous>, transform_indices = @transform_4, window_bounds = array<i64: 4, 36>}, {pipeline_mode = #tpu.pipeline_mode<synchronous>, transform_indices = @transform_5, window_bounds = array<i64: 4, 1>}, {pipeline_mode = #tpu.pipeline_mode<synchronous>, transform_indices = @transform_6, window_bounds = array<i64: 4, 1>}, {pipeline_mode = #tpu.pipeline_mode<synchronous>, transform_indices = @transform_7, window_bounds = array<i64: 4, 36>}, {pipeline_mode = #tpu.pipeline_mode<synchronous>, transform_indices = @transform_8, window_bounds = array<i64: 4, 1>}, {pipeline_mode = #tpu.pipeline_mode<synchronous>, transform_indices = @transform_9, window_bounds = array<i64: 4, 1>}, {transform_indices = @transform_10, window_bounds = array<i64: 1, 4, 256>}]} {
    %c0 = arith.constant 0 : index
    %c0_0 = arith.constant 0 : index
    %c0_1 = arith.constant 0 : index
    %0 = vector.load %arg1[%c0, %c0_0, %c0_1] : memref<1x4x256xf32, #tpu.memory_space<vmem>>, vector<1x4x256xf32>
    %1 = vector.shape_cast %0 : vector<1x4x256xf32> to vector<4x256xf32>
    %c0_2 = arith.constant 0 : index
    %c0_3 = arith.constant 0 : index
    %2 = vector.load %arg3[%c0_2, %c0_3] : memref<256x1xf32, #tpu.memory_space<vmem>>, vector<256x1xf32>
    %c17_i32 = arith.constant 17 : i32
    %3 = tpu.dynamic_rotate %1 by %c17_i32 dim 1 : vector<4x256xf32>, i32 -> vector<4x256xf32>
    %c0_4 = arith.constant 0 : index
    %c0_5 = arith.constant 0 : index
    %4 = vector.load %arg2[%c0_4, %c0_5] : memref<9x256xf32, #tpu.memory_space<vmem>>, vector<1x256xf32>
    %5 = vector.broadcast %4 : vector<1x256xf32> to vector<4x256xf32>
    %6 = arith.mulf %3, %5 : vector<4x256xf32>
    %c16_i32 = arith.constant 16 : i32
    %7 = tpu.dynamic_rotate %1 by %c16_i32 dim 1 : vector<4x256xf32>, i32 -> vector<4x256xf32>
    %c1 = arith.constant 1 : index
    %c0_6 = arith.constant 0 : index
    %8 = vector.load %arg2[%c1, %c0_6] : memref<9x256xf32, #tpu.memory_space<vmem>>, vector<1x256xf32>
    %9 = vector.broadcast %8 : vector<1x256xf32> to vector<4x256xf32>
    %10 = arith.mulf %7, %9 : vector<4x256xf32>
    %c15_i32 = arith.constant 15 : i32
    %11 = tpu.dynamic_rotate %1 by %c15_i32 dim 1 : vector<4x256xf32>, i32 -> vector<4x256xf32>
    %c2 = arith.constant 2 : index
    %c0_7 = arith.constant 0 : index
    %12 = vector.load %arg2[%c2, %c0_7] : memref<9x256xf32, #tpu.memory_space<vmem>>, vector<1x256xf32>
    %13 = vector.broadcast %12 : vector<1x256xf32> to vector<4x256xf32>
    %14 = arith.mulf %11, %13 : vector<4x256xf32>
    %c1_i32 = arith.constant 1 : i32
    %15 = tpu.dynamic_rotate %1 by %c1_i32 dim 1 : vector<4x256xf32>, i32 -> vector<4x256xf32>
    %c3 = arith.constant 3 : index
    %c0_8 = arith.constant 0 : index
    %16 = vector.load %arg2[%c3, %c0_8] : memref<9x256xf32, #tpu.memory_space<vmem>>, vector<1x256xf32>
    %17 = vector.broadcast %16 : vector<1x256xf32> to vector<4x256xf32>
    %18 = arith.mulf %15, %17 : vector<4x256xf32>
    %c255_i32 = arith.constant 255 : i32
    %19 = tpu.dynamic_rotate %1 by %c255_i32 dim 1 : vector<4x256xf32>, i32 -> vector<4x256xf32>
    %c5 = arith.constant 5 : index
    %c0_9 = arith.constant 0 : index
    %20 = vector.load %arg2[%c5, %c0_9] : memref<9x256xf32, #tpu.memory_space<vmem>>, vector<1x256xf32>
    %21 = vector.broadcast %20 : vector<1x256xf32> to vector<4x256xf32>
    %22 = arith.mulf %19, %21 : vector<4x256xf32>
    %c241_i32 = arith.constant 241 : i32
    %23 = tpu.dynamic_rotate %1 by %c241_i32 dim 1 : vector<4x256xf32>, i32 -> vector<4x256xf32>
    %c6 = arith.constant 6 : index
    %c0_10 = arith.constant 0 : index
    %24 = vector.load %arg2[%c6, %c0_10] : memref<9x256xf32, #tpu.memory_space<vmem>>, vector<1x256xf32>
    %25 = vector.broadcast %24 : vector<1x256xf32> to vector<4x256xf32>
    %26 = arith.mulf %23, %25 : vector<4x256xf32>
    %c240_i32 = arith.constant 240 : i32
    %27 = tpu.dynamic_rotate %1 by %c240_i32 dim 1 : vector<4x256xf32>, i32 -> vector<4x256xf32>
    %c7 = arith.constant 7 : index
    %c0_11 = arith.constant 0 : index
    %28 = vector.load %arg2[%c7, %c0_11] : memref<9x256xf32, #tpu.memory_space<vmem>>, vector<1x256xf32>
    %29 = vector.broadcast %28 : vector<1x256xf32> to vector<4x256xf32>
    %30 = arith.mulf %27, %29 : vector<4x256xf32>
    %c239_i32 = arith.constant 239 : i32
    %31 = tpu.dynamic_rotate %1 by %c239_i32 dim 1 : vector<4x256xf32>, i32 -> vector<4x256xf32>
    %c8 = arith.constant 8 : index
    %c0_12 = arith.constant 0 : index
    %32 = vector.load %arg2[%c8, %c0_12] : memref<9x256xf32, #tpu.memory_space<vmem>>, vector<1x256xf32>
    %33 = vector.broadcast %32 : vector<1x256xf32> to vector<4x256xf32>
    %34 = arith.mulf %31, %33 : vector<4x256xf32>
    %35 = tpu.concatenate %6, %10, %14, %18, %1, %22, %26, %30, %34 in 0 : vector<4x256xf32>, vector<4x256xf32>, vector<4x256xf32>, vector<4x256xf32>, vector<4x256xf32>, vector<4x256xf32>, vector<4x256xf32>, vector<4x256xf32>, vector<4x256xf32> -> vector<36x256xf32>
    %c0_13 = arith.constant 0 : index
    %c0_14 = arith.constant 0 : index
    %36 = vector.load %arg5[%c0_13, %c0_14] : memref<4x36xf32, #tpu.memory_space<vmem>>, vector<4x36xf32>
    %cst = arith.constant dense<0.000000e+00> : vector<4x256xf32>
    %37 = tpu.matmul %36, %35, %cst {dimension_numbers = #tpu.dot_dimension_numbers<[1], [0], [0], [1], [0, 0, 1, 1], [], []>} : vector<4x36xf32>, vector<36x256xf32>, vector<4x256xf32> -> vector<4x256xf32>
    %cst_15 = arith.constant dense<0.000000e+00> : vector<4x1xf32>
    %38 = tpu.matmul %37, %2, %cst_15 {dimension_numbers = #tpu.dot_dimension_numbers<[1], [0], [0], [1], [0, 0, 1, 1], [], []>} : vector<4x256xf32>, vector<256x1xf32>, vector<4x1xf32> -> vector<4x1xf32>
    %39 = arith.mulf %37, %37 : vector<4x256xf32>
    %cst_16 = arith.constant dense<0.000000e+00> : vector<4x1xf32>
    %40 = tpu.matmul %39, %2, %cst_16 {dimension_numbers = #tpu.dot_dimension_numbers<[1], [0], [0], [1], [0, 0, 1, 1], [], []>} : vector<4x256xf32>, vector<256x1xf32>, vector<4x1xf32> -> vector<4x1xf32>
    %cst_17 = arith.constant 3.906250e-03 : f32
    %41 = vector.broadcast %cst_17 : f32 to vector<4x1xf32>
    %42 = arith.mulf %38, %41 : vector<4x1xf32>
    %cst_18 = arith.constant 3.906250e-03 : f32
    %43 = vector.broadcast %cst_18 : f32 to vector<4x1xf32>
    %44 = arith.mulf %40, %43 : vector<4x1xf32>
    %45 = arith.mulf %42, %42 : vector<4x1xf32>
    %46 = arith.subf %44, %45 : vector<4x1xf32>
    %cst_19 = arith.constant 0.000000e+00 : f32
    %47 = vector.broadcast %cst_19 : f32 to vector<4x1xf32>
    %48 = arith.maximumf %46, %47 : vector<4x1xf32>
    %c0_20 = arith.constant 0 : index
    %c0_21 = arith.constant 0 : index
    %49 = vector.load %arg6[%c0_20, %c0_21] : memref<4x1xf32, #tpu.memory_space<vmem>>, vector<4x1xf32>
    %cst_22 = arith.constant 9.99999974E-6 : f32
    %50 = vector.broadcast %cst_22 : f32 to vector<4x1xf32>
    %51 = arith.addf %48, %50 : vector<4x1xf32>
    %52 = math.rsqrt %51 : vector<4x1xf32>
    %53 = arith.mulf %49, %52 : vector<4x1xf32>
    %c0_23 = arith.constant 0 : index
    %c0_24 = arith.constant 0 : index
    %54 = vector.load %arg7[%c0_23, %c0_24] : memref<4x1xf32, #tpu.memory_space<vmem>>, vector<4x1xf32>
    %55 = arith.mulf %42, %53 : vector<4x1xf32>
    %56 = arith.subf %54, %55 : vector<4x1xf32>
    %57 = vector.broadcast %53 : vector<4x1xf32> to vector<4x256xf32>
    %58 = arith.mulf %37, %57 : vector<4x256xf32>
    %59 = vector.broadcast %56 : vector<4x1xf32> to vector<4x256xf32>
    %60 = arith.addf %58, %59 : vector<4x256xf32>
    %cst_25 = arith.constant 0.000000e+00 : f32
    %61 = vector.broadcast %cst_25 : f32 to vector<4x256xf32>
    %62 = arith.maximumf %60, %61 : vector<4x256xf32>
    %c17_i32_26 = arith.constant 17 : i32
    %63 = tpu.dynamic_rotate %62 by %c17_i32_26 dim 1 : vector<4x256xf32>, i32 -> vector<4x256xf32>
    %c0_27 = arith.constant 0 : index
    %c0_28 = arith.constant 0 : index
    %64 = vector.load %arg2[%c0_27, %c0_28] : memref<9x256xf32, #tpu.memory_space<vmem>>, vector<1x256xf32>
    %65 = vector.broadcast %64 : vector<1x256xf32> to vector<4x256xf32>
    %66 = arith.mulf %63, %65 : vector<4x256xf32>
    %c16_i32_29 = arith.constant 16 : i32
    %67 = tpu.dynamic_rotate %62 by %c16_i32_29 dim 1 : vector<4x256xf32>, i32 -> vector<4x256xf32>
    %c1_30 = arith.constant 1 : index
    %c0_31 = arith.constant 0 : index
    %68 = vector.load %arg2[%c1_30, %c0_31] : memref<9x256xf32, #tpu.memory_space<vmem>>, vector<1x256xf32>
    %69 = vector.broadcast %68 : vector<1x256xf32> to vector<4x256xf32>
    %70 = arith.mulf %67, %69 : vector<4x256xf32>
    %c15_i32_32 = arith.constant 15 : i32
    %71 = tpu.dynamic_rotate %62 by %c15_i32_32 dim 1 : vector<4x256xf32>, i32 -> vector<4x256xf32>
    %c2_33 = arith.constant 2 : index
    %c0_34 = arith.constant 0 : index
    %72 = vector.load %arg2[%c2_33, %c0_34] : memref<9x256xf32, #tpu.memory_space<vmem>>, vector<1x256xf32>
    %73 = vector.broadcast %72 : vector<1x256xf32> to vector<4x256xf32>
    %74 = arith.mulf %71, %73 : vector<4x256xf32>
    %c1_i32_35 = arith.constant 1 : i32
    %75 = tpu.dynamic_rotate %62 by %c1_i32_35 dim 1 : vector<4x256xf32>, i32 -> vector<4x256xf32>
    %c3_36 = arith.constant 3 : index
    %c0_37 = arith.constant 0 : index
    %76 = vector.load %arg2[%c3_36, %c0_37] : memref<9x256xf32, #tpu.memory_space<vmem>>, vector<1x256xf32>
    %77 = vector.broadcast %76 : vector<1x256xf32> to vector<4x256xf32>
    %78 = arith.mulf %75, %77 : vector<4x256xf32>
    %c255_i32_38 = arith.constant 255 : i32
    %79 = tpu.dynamic_rotate %62 by %c255_i32_38 dim 1 : vector<4x256xf32>, i32 -> vector<4x256xf32>
    %c5_39 = arith.constant 5 : index
    %c0_40 = arith.constant 0 : index
    %80 = vector.load %arg2[%c5_39, %c0_40] : memref<9x256xf32, #tpu.memory_space<vmem>>, vector<1x256xf32>
    %81 = vector.broadcast %80 : vector<1x256xf32> to vector<4x256xf32>
    %82 = arith.mulf %79, %81 : vector<4x256xf32>
    %c241_i32_41 = arith.constant 241 : i32
    %83 = tpu.dynamic_rotate %62 by %c241_i32_41 dim 1 : vector<4x256xf32>, i32 -> vector<4x256xf32>
    %c6_42 = arith.constant 6 : index
    %c0_43 = arith.constant 0 : index
    %84 = vector.load %arg2[%c6_42, %c0_43] : memref<9x256xf32, #tpu.memory_space<vmem>>, vector<1x256xf32>
    %85 = vector.broadcast %84 : vector<1x256xf32> to vector<4x256xf32>
    %86 = arith.mulf %83, %85 : vector<4x256xf32>
    %c240_i32_44 = arith.constant 240 : i32
    %87 = tpu.dynamic_rotate %62 by %c240_i32_44 dim 1 : vector<4x256xf32>, i32 -> vector<4x256xf32>
    %c7_45 = arith.constant 7 : index
    %c0_46 = arith.constant 0 : index
    %88 = vector.load %arg2[%c7_45, %c0_46] : memref<9x256xf32, #tpu.memory_space<vmem>>, vector<1x256xf32>
    %89 = vector.broadcast %88 : vector<1x256xf32> to vector<4x256xf32>
    %90 = arith.mulf %87, %89 : vector<4x256xf32>
    %c239_i32_47 = arith.constant 239 : i32
    %91 = tpu.dynamic_rotate %62 by %c239_i32_47 dim 1 : vector<4x256xf32>, i32 -> vector<4x256xf32>
    %c8_48 = arith.constant 8 : index
    %c0_49 = arith.constant 0 : index
    %92 = vector.load %arg2[%c8_48, %c0_49] : memref<9x256xf32, #tpu.memory_space<vmem>>, vector<1x256xf32>
    %93 = vector.broadcast %92 : vector<1x256xf32> to vector<4x256xf32>
    %94 = arith.mulf %91, %93 : vector<4x256xf32>
    %95 = tpu.concatenate %66, %70, %74, %78, %62, %82, %86, %90, %94 in 0 : vector<4x256xf32>, vector<4x256xf32>, vector<4x256xf32>, vector<4x256xf32>, vector<4x256xf32>, vector<4x256xf32>, vector<4x256xf32>, vector<4x256xf32>, vector<4x256xf32> -> vector<36x256xf32>
    %c0_50 = arith.constant 0 : index
    %c0_51 = arith.constant 0 : index
    %96 = vector.load %arg8[%c0_50, %c0_51] : memref<4x36xf32, #tpu.memory_space<vmem>>, vector<4x36xf32>
    %cst_52 = arith.constant dense<0.000000e+00> : vector<4x256xf32>
    %97 = tpu.matmul %96, %95, %cst_52 {dimension_numbers = #tpu.dot_dimension_numbers<[1], [0], [0], [1], [0, 0, 1, 1], [], []>} : vector<4x36xf32>, vector<36x256xf32>, vector<4x256xf32> -> vector<4x256xf32>
    %cst_53 = arith.constant dense<0.000000e+00> : vector<4x1xf32>
    %98 = tpu.matmul %97, %2, %cst_53 {dimension_numbers = #tpu.dot_dimension_numbers<[1], [0], [0], [1], [0, 0, 1, 1], [], []>} : vector<4x256xf32>, vector<256x1xf32>, vector<4x1xf32> -> vector<4x1xf32>
    %99 = arith.mulf %97, %97 : vector<4x256xf32>
    %cst_54 = arith.constant dense<0.000000e+00> : vector<4x1xf32>
    %100 = tpu.matmul %99, %2, %cst_54 {dimension_numbers = #tpu.dot_dimension_numbers<[1], [0], [0], [1], [0, 0, 1, 1], [], []>} : vector<4x256xf32>, vector<256x1xf32>, vector<4x1xf32> -> vector<4x1xf32>
    %cst_55 = arith.constant 3.906250e-03 : f32
    %101 = vector.broadcast %cst_55 : f32 to vector<4x1xf32>
    %102 = arith.mulf %98, %101 : vector<4x1xf32>
    %cst_56 = arith.constant 3.906250e-03 : f32
    %103 = vector.broadcast %cst_56 : f32 to vector<4x1xf32>
    %104 = arith.mulf %100, %103 : vector<4x1xf32>
    %105 = arith.mulf %102, %102 : vector<4x1xf32>
    %106 = arith.subf %104, %105 : vector<4x1xf32>
    %cst_57 = arith.constant 0.000000e+00 : f32
    %107 = vector.broadcast %cst_57 : f32 to vector<4x1xf32>
    %108 = arith.maximumf %106, %107 : vector<4x1xf32>
    %c0_58 = arith.constant 0 : index
    %c0_59 = arith.constant 0 : index
    %109 = vector.load %arg9[%c0_58, %c0_59] : memref<4x1xf32, #tpu.memory_space<vmem>>, vector<4x1xf32>
    %cst_60 = arith.constant 9.99999974E-6 : f32
    %110 = vector.broadcast %cst_60 : f32 to vector<4x1xf32>
    %111 = arith.addf %108, %110 : vector<4x1xf32>
    %112 = math.rsqrt %111 : vector<4x1xf32>
    %113 = arith.mulf %109, %112 : vector<4x1xf32>
    %c0_61 = arith.constant 0 : index
    %c0_62 = arith.constant 0 : index
    %114 = vector.load %arg10[%c0_61, %c0_62] : memref<4x1xf32, #tpu.memory_space<vmem>>, vector<4x1xf32>
    %115 = arith.mulf %102, %113 : vector<4x1xf32>
    %116 = arith.subf %114, %115 : vector<4x1xf32>
    %117 = vector.broadcast %113 : vector<4x1xf32> to vector<4x256xf32>
    %118 = arith.mulf %97, %117 : vector<4x256xf32>
    %119 = vector.broadcast %116 : vector<4x1xf32> to vector<4x256xf32>
    %120 = arith.addf %118, %119 : vector<4x256xf32>
    %121 = arith.addf %1, %120 : vector<4x256xf32>
    %c0_63 = arith.constant 0 : index
    %c0_64 = arith.constant 0 : index
    %c0_65 = arith.constant 0 : index
    %122 = vector.load %arg11[%c0_63, %c0_64, %c0_65] : memref<1x4x256xf32, #tpu.memory_space<vmem>>, vector<1x4x256xf32>
    %123 = vector.shape_cast %122 : vector<1x4x256xf32> to vector<4x256xf32>
    %124 = vector.shape_cast %121 : vector<4x256xf32> to vector<1x4x256xf32>
    tpu.vector_store %arg11[%c0_63, %c0_64, %c0_65], %124 {strides = array<i32>} : memref<1x4x256xf32, #tpu.memory_space<vmem>>, vector<1x4x256xf32>,
    return
  }
  func.func @transform_0(%arg0: i32) -> (i32, i32, i32) {
    %c0_i32 = arith.constant 0 : i32
    %c0_i32_0 = arith.constant 0 : i32
    %c0_i32_1 = arith.constant 0 : i32
    return %arg0, %c0_i32, %c0_i32_0 : i32, i32, i32
  }
  func.func @transform_1(%arg0: i32) -> (i32, i32) {
    %c0_i32 = arith.constant 0 : i32
    %c0_i32_0 = arith.constant 0 : i32
    %c0_i32_1 = arith.constant 0 : i32
    return %c0_i32, %c0_i32_0 : i32, i32
  }
  func.func @transform_2(%arg0: i32) -> (i32, i32) {
    %c0_i32 = arith.constant 0 : i32
    %c0_i32_0 = arith.constant 0 : i32
    %c0_i32_1 = arith.constant 0 : i32
    return %c0_i32, %c0_i32_0 : i32, i32
  }
  func.func @transform_3(%arg0: i32) -> (i32, i32) {
    %c0_i32 = arith.constant 0 : i32
    %c0_i32_0 = arith.constant 0 : i32
    %c0_i32_1 = arith.constant 0 : i32
    return %c0_i32, %c0_i32_0 : i32, i32
  }
  func.func @transform_4(%arg0: i32) -> (i32, i32) {
    %c0_i32 = arith.constant 0 : i32
    %c0_i32_0 = arith.constant 0 : i32
    %c0_i32_1 = arith.constant 0 : i32
    return %c0_i32, %c0_i32_0 : i32, i32
  }
  func.func @transform_5(%arg0: i32) -> (i32, i32) {
    %c0_i32 = arith.constant 0 : i32
    %c0_i32_0 = arith.constant 0 : i32
    %c0_i32_1 = arith.constant 0 : i32
    return %c0_i32, %c0_i32_0 : i32, i32
  }
  func.func @transform_6(%arg0: i32) -> (i32, i32) {
    %c0_i32 = arith.constant 0 : i32
    %c0_i32_0 = arith.constant 0 : i32
    %c0_i32_1 = arith.constant 0 : i32
    return %c0_i32, %c0_i32_0 : i32, i32
  }
  func.func @transform_7(%arg0: i32) -> (i32, i32) {
    %c0_i32 = arith.constant 0 : i32
    %c0_i32_0 = arith.constant 0 : i32
    %c0_i32_1 = arith.constant 0 : i32
    return %c0_i32, %c0_i32_0 : i32, i32
  }
  func.func @transform_8(%arg0: i32) -> (i32, i32) {
    %c0_i32 = arith.constant 0 : i32
    %c0_i32_0 = arith.constant 0 : i32
    %c0_i32_1 = arith.constant 0 : i32
    return %c0_i32, %c0_i32_0 : i32, i32
  }
  func.func @transform_9(%arg0: i32) -> (i32, i32) {
    %c0_i32 = arith.constant 0 : i32
    %c0_i32_0 = arith.constant 0 : i32
    %c0_i32_1 = arith.constant 0 : i32
    return %c0_i32, %c0_i32_0 : i32, i32
  }
  func.func @transform_10(%arg0: i32) -> (i32, i32, i32) {
    %c0_i32 = arith.constant 0 : i32
    %c0_i32_0 = arith.constant 0 : i32
    %c0_i32_1 = arith.constant 0 : i32
    return %arg0, %c0_i32, %c0_i32_0 : i32, i32, i32
  }
}

</mosaic_0001>

<bundles_post_ra>
// kernel: tpu_custom_call.1
= control target key start
LH: loop header
LB: loop body
LE: loop exit
PB: predicated region body
PF: predicated region fallthrough
CT: control target
= control target key end

     0   :  { %15 = vsyncpa [#allocation3], 0  ;;  %s2015_s0 = inlined_call_operand.vmem [shape: f32[2,4,256], index: 0, kind: input, shape index: {}]   ;;  %s2016_s1 = inlined_call_operand.vmem [shape: f32[9,256], index: 1, kind: input, shape index: {}]   ;;  %s2017_s2 = inlined_call_operand.vmem [shape: f32[256,1], index: 2, kind: input, shape index: {}]   ;;  %s2018_s3 = inlined_call_operand.vmem [shape: f32[1,256], index: 3, kind: input, shape index: {}]   ;;  %s2019_s4 = inlined_call_operand.vmem [shape: f32[4,36], index: 4, kind: input, shape index: {}]   ;;  %s2020_s5 = inlined_call_operand.vmem [shape: f32[4,1], index: 5, kind: input, shape index: {}]   ;;  %s2021_s6 = inlined_call_operand.vmem [shape: f32[4,1], index: 6, kind: input, shape index: {}]   ;;  %s2022_s7 = inlined_call_operand.vmem [shape: f32[4,36], index: 7, kind: input, shape index: {}]   ;;  %s2023_s8 = inlined_call_operand.vmem [shape: f32[4,1], index: 8, kind: input, shape index: {}]   ;;  %s2024_s9 = inlined_call_operand.vmem [shape: f32[4,1], index: 9, kind: input, shape index: {}]   ;;  %s2025_s10 = inlined_call_operand.hbm [shape: f32[2,4,256], index: 10, kind: output, shape index: {}]  }
   0x1   :  { %17 = vsyncpa [#allocation3 + $0x1], 0  ;;  %s1327_s12 = smov 0   ;;  %s1329_s13 = smov 0  }
   0x2   :  { %s1331_s14 = smov 0   ;;  %s1333_s15 = smov 0  }
   0x3 LB: > { %s1348_s16 = sadd.s32 4294967295, %s1261_s15   ;;  %s1115_s17 = sadd.s32 4294967294, %s1261_s15   ;;  %s1261_s15 = sphi %s1333_s15, %s2073_s15   ;;  %s1257_s14 = sphi %s1331_s14, %s2072_s14   ;;  %s1253_s13 = sphi %s1329_s13, %s2071_s13   ;;  %s1249_s12 = sphi %s1327_s12, %s2070_s12  }
   0x4   : > { %s1352_s18 = sadd.s32 1, %s1261_s15   ;;  %s245_s19 = sadd.s32 1, %s1257_s14 }
   0x5   : > { %s242_s20 = ssub.s32 %s1261_s15, %s1352_s18  ;;  %p255_p0 = scmp.ne.s32.totalorder %s1257_s14, %s1253_s13 }
   0x6   : > { %p243_p1 = scmp.eq.s32.totalorder %s242_s20, 0  ;;  %p256_p2 = scmp.eq.s32.totalorder %s1348_s16, 1 }
   0x7   : > { %p261_p3 = scmp.ne.s32.totalorder %s1253_s13, %s1249_s12  ;;  %p262_p4 = scmp.eq.s32.totalorder %s1115_s17, 1 }
   0x8   : > { %s1363_s21 = scalar_select %p243_p1, %s1257_s14, %s245_s19  }
   0x9   : > { %p1365_p5 = por %p256_p2, %p255_p0  ;;  %p1369_p6 = por %p262_p4, %p261_p3 }
   0xa   : > { %p1118_p7 = scmp.ge.s32.totalorder %s1261_s15, 1  ;;  %p315_p8 = scmp.lt.s32.totalorder %s1261_s15, 3 }
   0xc   : > { %p316_p9 = pnand %p1118_p7, %p315_p8 }
   0xd   : > { %p353_p10 = scmp.lt.s32.totalorder (!%p316_p9), %s1348_s16, 1  ;;  %s2030_s29 = smov (!%p316_p9), 16  }
   0xe   : > { %319 = sbr.rel (%p316_p9) target bundleno = 1221 (0x4c5), region = 60  ;;  %s2028_s30 = smov (!%p316_p9), 15  }
   0xf   : > { %s2032_s11 = smov (!%p316_p9), 1   ;;  %s1266_s3 = smov (!%p316_p9), 127  }
  0x10   : > { %s1267_s17 = smov (!%p316_p9), 113   ;;  %s1268_s19 = smov (!%p316_p9), 112  }
  0x11   : > { %s2026_s20 = smov (!%p316_p9), 17  }
  0x13   : > { %s354_s24 = scalar_select %p353_p10, %s1348_s16, 1  ;;  %v401_v25 = vlaneseq  ;;  %v1424_v27 = vld [vmem:[%s2017_s2 + $0x78] sm:$0xff]  ;;  %v1434_v29 = vld [vmem:[%s2017_s2 + $0x70] sm:$0xff]  ;;  %v1446_v31 = vld [vmem:[%s2017_s2 + $0x68] sm:$0xff]  ;;  %vm590_vm6 = vcmask 1043456   ;;  %vm600_vm9 = vcmask 293888  }
  0x14   : > { %v1429_v28 = vld [vmem:[%s2017_s2 + $0xf8] sm:$0xff]  ;;  %650 = vmatpush.msra.mxu2 %v1424_v27  ;;  %v1441_v30 = vld [vmem:[%s2017_s2 + $0xf0] sm:$0xff]  ;;  %v1451_v32 = vld [vmem:[%s2017_s2 + $0xe8] sm:$0xff] }
  0x15   : > { %s1142_s25 = sshll.u32 %s354_s24, 3  ;;  %s1270_s24 = smov 111   ;;  %670 = vmatpush.msra.mxu3 %v1429_v28  ;;  %v1453_v33 = vand.u32 127, %v401_v25  ;;  %v1460_v34 = vld [vmem:[%s2016_s1 + $0x5] ss:$8 sm:$0x3] }
  0x16   : > { %s357_s28 = scalar_lea.vmem %s2015_s0, %s1142_s25  ;;  %651 = vmatpush.msra.mxu2 %v1434_v29  ;;  %v1465_v35 = vld [vmem:[%s2017_s2 + $0x60] sm:$0xff]  ;;  %v1483_v38 = vld [vmem:[%s2017_s2 + $0x58] sm:$0xff]  ;;  %v2045_v41 = vperm.slane %v1460_v34, 0  ;;  %v2044_v42 = vperm.slane %v1460_v34, 1  ;;  %v1512_v49 = vld [vmem:[%s2017_s2 + $0x50] sm:$0xff]  ;;  %s2053_s25 = smov 15  }
  0x17   : > { %v1380_v0 = vld [vmem:[%s357_s28] sm:$0xff]  ;;  %671 = vmatpush.msra.mxu3 %v1441_v30  ;;  %vm486_vm0 = vcmp.lt.s32.totalorder %v1453_v33, 127  ;;  %v1488_v39 = vld [vmem:[%s2017_s2 + $0xd8] sm:$0xff]  ;;  %vm528_vm1 = vcmp.lt.s32.totalorder %v1453_v33, 112  ;;  %v1517_v50 = vld [vmem:[%s2017_s2 + $0xd0] sm:$0xff]  ;;  %vm465_vm2 = vcmp.lt.s32.totalorder %v1453_v33, 1 }
  0x18   : > { %392 = vst [vmem:[#allocation1] ss:$2 sm:$0xff] %v1380_v0  ;;  %v1470_v36 = vld [vmem:[%s2017_s2 + $0xe0] sm:$0xff]  ;;  %652 = vmatpush.msra.mxu2 %v1446_v31  ;;  %v1531_v56 = vld [vmem:[%s2017_s2 + $0x48] sm:$0xff]  ;;  %vm507_vm3 = vcmp.lt.s32.totalorder %v1453_v33, 113  ;;  %vm423_vm4 = vcmp.lt.s32.totalorder %v1453_v33, 16 }
  0x19   : > { %672 = vmatpush.msra.mxu3 %v1451_v32  ;;  %v1478_v37 = vld [vmem:[%s2016_s1 + $0x7] ss:$8 sm:$0x3]  ;;  %v1493_v40 = vld [vmem:[%s2016_s1 + $0x1] ss:$8 sm:$0x3] }
  0x1a   : > { %653 = vmatpush.msra.mxu2 %v1465_v35  ;;  %v1503_v44 = vld [vmem:[%s2016_s1 + $0x3] ss:$8 sm:$0x3]  ;;  %v2047_v51 = vperm.slane %v1478_v37, 0  ;;  %v2046_v52 = vperm.slane %v1478_v37, 1  ;;  %v2041_v53 = vperm.slane %v1493_v40, 0 }
  0x1b   : > { %673 = vmatpush.msra.mxu3 %v1470_v36  ;;  %v1536_v57 = vld [vmem:[%s2017_s2 + $0xc8] sm:$0xff]  ;;  %v2040_v58 = vperm.slane %v1493_v40, 1  ;;  %v2036_v59 = vperm.slane %v1503_v44, 0  ;;  %v1551_v62 = vld [vmem:[%s2016_s1 + $0x10] ss:$8 sm:$0x3] }
  0x1c   : > { %654 = vmatpush.msra.mxu2 %v1483_v38  ;;  %v2035_v63 = vperm.slane %v1503_v44, 1  ;;  %vm549_vm5 = vcmp.lt.s32.totalorder %v1453_v33, 111  ;;  %vm403_vm7 = vcmp.lt.s32.totalorder %v1453_v33, 17  ;;  %vm444_vm8 = vcmp.lt.s32.totalorder %v1453_v33, 15 }
  0x1d   : > { %674 = vmatpush.msra.mxu3 %v1488_v39 }
  0x1e   : > { %655 = vmatpush.msra.mxu2 %v1512_v49 }
  0x1f   : > { %v393_v1 = vld.sshfl [vmem:[#allocation1] sm:$0xff pattern:$0x75316420]  ;;  %v394_v2 = vld.sshfl [vmem:[#allocation1 + $0x8] sm:$0xff pattern:$0x75316420]  ;;  %675 = vmatpush.msra.mxu3 %v1517_v50 }
  0x20   : > { %414 = vst [vmem:[#allocation1] ss:$2 sm:$0xff] %v1380_v0  ;;  %656 = vmatpush.msra.mxu2 %v1531_v56 }
  0x21   : > { %676 = vmatpush.msra.mxu3 %v1536_v57 }
  0x27   : > { %v415_v3 = vld.sshfl [vmem:[#allocation1] sm:$0xff pattern:$0x75316420]  ;;  %v416_v4 = vld.sshfl [vmem:[#allocation1 + $0x8] sm:$0xff pattern:$0x75316420] }
  0x28   : > { %435 = vst [vmem:[#allocation1] ss:$2 sm:$0xff] %v1380_v0  ;;  %419 = vrot.lane.b32.xlu1 %v415_v3, %s2030_s29  ;;  %421 = vrot.lane.b32.xlu2 %v416_v4, %s2030_s29  ;;  %v1569_v3 = vld [vmem:[%s2017_s2 + $0xc0] sm:$0xff] }
  0x29   : > { %677 = vmatpush.msra.mxu3 %v1569_v3 }
  0x2f   : > { %v436_v5 = vld.sshfl [vmem:[#allocation1] sm:$0xff pattern:$0x75316420]  ;;  %v437_v6 = vld.sshfl [vmem:[#allocation1 + $0x8] sm:$0xff pattern:$0x75316420] }
  0x30   : > { %440 = vrot.lane.b32.xlu0 %v436_v5, %s2028_s30  ;;  %456 = vst [vmem:[#allocation1] ss:$2 sm:$0xff] %v1380_v0 }
  0x37   : > { %v458_v7 = vld.sshfl [vmem:[#allocation1 + $0x8] sm:$0xff pattern:$0x75316420]  ;;  %v457_v8 = vld.sshfl [vmem:[#allocation1] sm:$0xff pattern:$0x75316420] }
  0x38   : > { %463 = vrot.lane.b32.xlu0 %v458_v7, %s2032_s11  ;;  %477 = vst [vmem:[#allocation1] ss:$2 sm:$0xff] %v1380_v0  ;;  %461 = vrot.lane.b32.xlu2 %v457_v8, %s2032_s11  ;;  %v2048_v7 = vperm.slane %v1551_v62, 1  ;;  %v1586_v8 = vld [vmem:[%s2017_s2 + $0x38] sm:$0xff]  ;;  %s2051_s11 = smov 1  }
  0x3f   : > { %v478_v9 = vld.sshfl [vmem:[#allocation1] sm:$0xff pattern:$0x75316420]  ;;  %v479_v10 = vld.sshfl [vmem:[#allocation1 + $0x8] sm:$0xff pattern:$0x75316420] }
  0x40   : > { %498 = vst [vmem:[#allocation1] ss:$2 sm:$0xff] %v1380_v0  ;;  %482 = vrot.lane.b32.xlu2 %v478_v9, %s1266_s3 }
  0x47   : > { %v499_v11 = vld.sshfl [vmem:[#allocation1] sm:$0xff pattern:$0x75316420]  ;;  %v500_v12 = vld.sshfl [vmem:[#allocation1 + $0x8] sm:$0xff pattern:$0x75316420] }
  0x48   : > { %503 = vrot.lane.b32.xlu0 %v499_v11, %s1267_s17  ;;  %505 = vrot.lane.b32.xlu1 %v500_v12, %s1267_s17  ;;  %519 = vst [vmem:[#allocation1] ss:$2 sm:$0xff] %v1380_v0 }
  0x49   : > { %484 = vrot.lane.b32.xlu2 %v479_v10, %s1266_s3 }
  0x4f   : > { %v520_v13 = vld.sshfl [vmem:[#allocation1] sm:$0xff pattern:$0x75316420]  ;;  %v521_v14 = vld.sshfl [vmem:[#allocation1 + $0x8] sm:$0xff pattern:$0x75316420] }
  0x50   : > { %524 = vrot.lane.b32.xlu0 %v520_v13, %s1268_s19  ;;  %540 = vst [vmem:[#allocation1] ss:$2 sm:$0xff] %v1380_v0  ;;  %v1597_v13 = vld [vmem:[%s2017_s2 + $0xb8] sm:$0xff] }
  0x51   : > { %397 = vrot.lane.b32.xlu2 %v393_v1, %s2026_s20  ;;  %v1559_v1 = vld [vmem:[%s2016_s1 + $0x6] ss:$8 sm:$0x3]  ;;  %678 = vmatpush.msra.mxu3 %v1597_v13 }
  0x52   : > { %v2037_v9 = vperm.slane %v1559_v1, 0  ;;  %v2034_v10 = vperm.slane %v1559_v1, 1 }
  0x57   : > { %v541_v15 = vld.sshfl [vmem:[#allocation1] sm:$0xff pattern:$0x75316420]  ;;  %v542_v16 = vld.sshfl [vmem:[#allocation1 + $0x8] sm:$0xff pattern:$0x75316420] }
  0x58   : > { %526 = vrot.lane.b32.xlu0 %v521_v14, %s1268_s19  ;;  %545 = vrot.lane.b32.xlu1 %v541_v15, %s1270_s24  ;;  %573 = vst [vmem:[#allocation1] ss:$2 sm:$0xff] %v1380_v0 }
  0x60   : > { %399 = vrot.lane.b32.xlu0 %v394_v2, %s2026_s20  ;;  %547 = vrot.lane.b32.xlu1 %v542_v16, %s1270_s24  ;;  %v1564_v2 = vld [vmem:[%s2017_s2 + $0x40] sm:$0xff]  ;;  %s2052_s20 = smov 16  }
  0x61   : > { %657 = vmatpush.msra.mxu2 %v1564_v2 }
  0x63   : > { %658 = vmatpush.msra.mxu2 %v1586_v8 }
  0x68   : > { %442 = vrot.lane.b32.xlu1 %v437_v6, %s2028_s30  ;;  %v555_v6 = vperm.slane %v1551_v62, 0  ;;  %s350_s30 = sand.u32 1, %s1253_s13  }
  0x69   : > { %s1119_s29 = sshll.u32 %s350_s30, 3 }
  0x82   : > { %v1409_v18 = vpop.permute.xlu2 %421 }
  0x92   : > { %v1413_v20 = vpop.permute.xlu2 %461 }
  0x9a   : > { %v1415_v21 = vpop.permute.xlu1 %419  ;;  %v483_v23 = vpop.permute.xlu2 %482 }
  0xa2   : > { %v1407_v17 = vpop.permute.xlu0 %440 }
  0xa3   : > { %v485_v43 = vpop.permute.xlu2 %484 }
  0xa4   : > { %v487_v45 = vsel %vm486_vm0, %v483_v23, %v485_v43  ;;  %v488_v46 = vsel %vm486_vm0, %v485_v43, %v483_v23 }
  0xa5   : > { %v1542_v60 = vmul.f32 %v2045_v41, %v487_v45  ;;  %v1546_v61 = vmul.f32 %v2044_v42, %v488_v46 }
  0xa7   : > { %v580_v11 = vrot.slane %v1542_v60, 4  ;;  %v581_v12 = vrot.slane %v1546_v61, 4  ;;  %v1656_v61 = vld [vmem:[%s2016_s1 + $0x2] ss:$8 sm:$0x3] }
  0xaa   : > { %v1411_v19 = vpop.permute.xlu0 %463 }
  0xab   : > { %v466_v14 = vsel %vm465_vm2, %v1413_v20, %v1411_v19  ;;  %v467_v15 = vsel %vm465_vm2, %v1411_v19, %v1413_v20 }
  0xba   : > { %v1417_v22 = vpop.permute.xlu0 %503  ;;  %v1419_v24 = vpop.permute.xlu1 %505 }
  0xbb   : > { %v508_v16 = vsel %vm507_vm3, %v1417_v22, %v1419_v24  ;;  %v509_v23 = vsel %vm507_vm3, %v1419_v24, %v1417_v22  ;;  %v1628_v22 = vld [vmem:[%s2016_s1] ss:$8 sm:$0x3] }
  0xbc   : > { %v518_v60 = vmul.f32 %v2034_v10, %v509_v23  ;;  %v398_v23 = vpop.permute.xlu2 %397  ;;  %v1673_v10 = vld [vmem:[%s2017_s2 + $0xa8] sm:$0xff] }
  0xc2   : > { %v525_v26 = vpop.permute.xlu0 %524 }
  0xca   : > { %v527_v47 = vpop.permute.xlu0 %526  ;;  %v546_v48 = vpop.permute.xlu1 %545 }
  0xcb   : > { %v529_v54 = vsel %vm528_vm1, %v525_v26, %v527_v47  ;;  %v530_v55 = vsel %vm528_vm1, %v527_v47, %v525_v26  ;;  %v1618_v26 = vld [vmem:[%s2017_s2 + $0x30] sm:$0xff] }
  0xcc   : > { %v538_v4 = vmul.f32 %v2047_v51, %v529_v54  ;;  %v539_v5 = vmul.f32 %v2046_v52, %v530_v55  ;;  %v1638_v47 = vld [vmem:[%s2017_s2 + $0xb0] sm:$0xff]  ;;  %v424_v54 = vsel %vm423_vm4, %v1415_v21, %v1409_v18  ;;  %v517_v55 = vmul.f32 %v2037_v9, %v508_v16  ;;  %659 = vmatpush.msra.mxu2 %v1618_v26  ;;  %v1714_v9 = vld [vmem:[%s2017_s2 + $0x98] sm:$0xff] }
  0xcd   : > { %v476_v16 = vmul.f32 %v2035_v63, %v466_v14  ;;  %v2038_v14 = vperm.slane %v1628_v22, 1  ;;  %679 = vmatpush.msra.mxu3 %v1638_v47  ;;  %v2042_v63 = vperm.slane %v1656_v61, 1 }
  0xce   : > { %v586_v43 = vrot.slane %v538_v4, 4  ;;  %v587_v45 = vrot.slane %v539_v5, 4  ;;  %v574_v4 = vld.sshfl [vmem:[#allocation1] sm:$0xff pattern:$0x75316420]  ;;  %v425_v5 = vsel %vm423_vm4, %v1409_v18, %v1415_v21  ;;  %v2039_v21 = vperm.slane %v1628_v22, 0 }
  0xcf   : > { %v1678_v18 = vld [vmem:[%s2017_s2 + $0x20] sm:$0xff]  ;;  %680 = vmatpush.msra.mxu3 %v1673_v10 }
  0xd2   : > { %v548_v25 = vpop.permute.xlu1 %547 }
  0xd3   : > { %v550_v19 = vsel %vm549_vm5, %v546_v48, %v548_v25  ;;  %v551_v20 = vsel %vm549_vm5, %v548_v25, %v546_v48  ;;  %v1643_v48 = vld [vmem:[%s2017_s2 + $0x28] sm:$0xff]  ;;  %v475_v25 = vmul.f32 %v2036_v59, %v467_v15  ;;  %v597_v15 = vsel %vm590_vm6, %v517_v55, %v586_v43  ;;  %v1693_v43 = vld [vmem:[%s2017_s2 + $0xa0] sm:$0xff] }
  0xd4   : > { %v559_v24 = vmul.f32 %v555_v6, %v550_v19  ;;  %v560_v46 = vmul.f32 %v2048_v7, %v551_v20  ;;  %v400_v19 = vpop.permute.xlu0 %399  ;;  %v575_v20 = vld.sshfl [vmem:[#allocation1 + $0x8] sm:$0xff pattern:$0x75316420]  ;;  %660 = vmatpush.msra.mxu2 %v1643_v48  ;;  %v595_v59 = vsel %vm590_vm6, %v574_v4, %v580_v11  ;;  %v433_v11 = vmul.f32 %v2041_v53, %v425_v5  ;;  %v737_v7 = vld [vmem:[%s2020_s5] sm:$0xf] }
  0xd5   : > { %v404_v55 = vsel %vm403_vm7, %v398_v23, %v400_v19  ;;  %v434_v4 = vmul.f32 %v2040_v58, %v424_v54  ;;  %681 = vmatpush.msra.mxu3 %v1693_v43 }
  0xd6   : > { %1129 = vmatpush.msk.msra.mxu0 %vm590_vm6, %v559_v24  ;;  %1131 = vmatpush.msk.msra.mxu1 %vm590_vm6, %v560_v46  ;;  %v598_v24 = vsel %vm590_vm6, %v518_v60, %v587_v45  ;;  %v2043_v46 = vperm.slane %v1656_v61, 0  ;;  %v1698_v45 = vld [vmem:[%s2017_s2 + $0x18] sm:$0xff]  ;;  %v405_v60 = vsel %vm403_vm7, %v400_v19, %v398_v23  ;;  %v569_v23 = vrot.slane %v475_v25, 4 }
  0xd7   : > { %661 = vmatpush.msra.mxu2 %v1678_v18  ;;  %v570_v19 = vrot.slane %v476_v16, 4  ;;  %v412_v54 = vmul.f32 %v2039_v21, %v405_v60  ;;  %682 = vmatpush.msra.mxu3 %v1714_v9  ;;  %v1747_v60 = vld [vmem:[%s2017_s2 + $0x8] sm:$0xff] }
  0xd8   : > { %622 = vmatpush.msra.mxu0 %v597_v15  ;;  %642 = vmatpush.msra.mxu1 %v598_v24  ;;  %v596_v15 = vsel %vm590_vm6, %v575_v20, %v581_v12  ;;  %v1719_v12 = vld [vmem:[%s2017_s2 + $0x10] sm:$0xff]  ;;  %v413_v20 = vmul.f32 %v2038_v14, %v404_v55  ;;  %v563_v55 = vrot.slane %v433_v11, 4  ;;  %v1761_v11 = vld [vmem:[%s2017_s2 + $0x88] sm:$0xff] }
  0xd9   : > { %662 = vmatpush.msra.mxu2 %v1698_v45 }
  0xda   : > { %v443_v24 = vpop.permute.xlu1 %442  ;;  %623 = vmatpush.msra.mxu0 %v595_v59  ;;  %643 = vmatpush.msra.mxu1 %v596_v15  ;;  %v564_v15 = vrot.slane %v434_v4, 4  ;;  %v591_v14 = vsel %vm590_vm6, %v412_v54, %v563_v55 }
  0xdb   : > { %v445_v5 = vsel %vm444_vm8, %v1407_v17, %v443_v24  ;;  %v446_v59 = vsel %vm444_vm8, %v443_v24, %v1407_v17  ;;  %663 = vmatpush.msra.mxu2 %v1719_v12  ;;  %v1742_v17 = vld [vmem:[%s2017_s2 + $0x90] sm:$0xff] }
  0xdc   : > { %v454_v25 = vmul.f32 %v2043_v46, %v446_v59  ;;  %v455_v16 = vmul.f32 %v2042_v63, %v445_v5  ;;  %v599_v59 = vld [vmem:[%s2019_s4] sm:$0xf]  ;;  %v592_v21 = vsel %vm590_vm6, %v413_v20, %v564_v15  ;;  %683 = vmatpush.msra.mxu3 %v1742_v17  ;;  %v1271_v15 = vmov 0  }
  0xdd   : > { %664 = vmatpush.msra.mxu2 %v1747_v60  ;;  %1192 = vset.pattern.permute.xlu1 %v1271_v15 }
  0xde   : > { %v593_v24 = vsel %vm590_vm6, %v454_v25, %v569_v23  ;;  %v594_v5 = vsel %vm590_vm6, %v455_v16, %v570_v19  ;;  %684 = vmatpush.msra.mxu3 %v1761_v11  ;;  %1193 = vset.pattern.permute.xlu2 %v1271_v15 }
  0xdf   : > { %624 = vmatpush.msra.mxu0 %v593_v24  ;;  %644 = vmatpush.msra.mxu1 %v594_v5 }
  0xe0   : > { %1194 = vset.pattern.permute.xlu0 %v1271_v15 }
  0xe1   : > { %625 = vmatpush.msra.mxu0 %v591_v14  ;;  %645 = vmatpush.msra.mxu1 %v592_v21  ;;  %v1799_v21 = vld [vmem:[%s2017_s2] sm:$0xff] }
  0xe2   : > { %1130 = vmatmul.msk.f32.vlgmr.msra.gmra.mxu0 %vm600_vm9, %v599_v59  ;;  %1132 = vmatmul.msk.f32.vlgmr.msra.gmra.mxu1 %vm600_vm9, %v599_v59  ;;  %v1804_v14 = vld [vmem:[%s2017_s2 + $0x80] sm:$0xff] }
  0xe3   : > { %692 = vmatpush.msrb.mxu0 %v1424_v27  ;;  %712 = vmatpush.msrb.mxu1 %v1429_v28 }
  0xe4   : > { %665 = vmatpush.msra.mxu2 %v1799_v21  ;;  %685 = vmatpush.msra.mxu3 %v1804_v14 }
  0xe5   : > { %693 = vmatpush.msrb.mxu0 %v1434_v29  ;;  %713 = vmatpush.msrb.mxu1 %v1441_v30 }
  0xe7   : > { %694 = vmatpush.msrb.mxu0 %v1446_v31  ;;  %714 = vmatpush.msrb.mxu1 %v1451_v32 }
  0xe9   : > { %695 = vmatpush.msrb.mxu0 %v1465_v35  ;;  %715 = vmatpush.msrb.mxu1 %v1470_v36 }
  0xeb   : > { %696 = vmatpush.msrb.mxu0 %v1483_v38  ;;  %716 = vmatpush.msrb.mxu1 %v1488_v39 }
  0xed   : > { %697 = vmatpush.msrb.mxu0 %v1512_v49  ;;  %717 = vmatpush.msrb.mxu1 %v1517_v50 }
  0xef   : > { %698 = vmatpush.msrb.mxu0 %v1531_v56  ;;  %718 = vmatpush.msrb.mxu1 %v1536_v57 }
  0xf1   : > { %699 = vmatpush.msrb.mxu0 %v1564_v2  ;;  %719 = vmatpush.msrb.mxu1 %v1569_v3 }
  0xf3   : > { %700 = vmatpush.msrb.mxu0 %v1586_v8  ;;  %720 = vmatpush.msrb.mxu1 %v1597_v13 }
  0xf5   : > { %701 = vmatpush.msrb.mxu0 %v1618_v26  ;;  %721 = vmatpush.msrb.mxu1 %v1638_v47 }
  0xf7   : > { %702 = vmatpush.msrb.mxu0 %v1643_v48  ;;  %722 = vmatpush.msrb.mxu1 %v1673_v10 }
  0xf9   : > { %703 = vmatpush.msrb.mxu0 %v1678_v18  ;;  %723 = vmatpush.msrb.mxu1 %v1693_v43 }
  0xfb   : > { %704 = vmatpush.msrb.mxu0 %v1698_v45  ;;  %724 = vmatpush.msrb.mxu1 %v1714_v9 }
  0xfd   : > { %705 = vmatpush.msrb.mxu0 %v1719_v12  ;;  %725 = vmatpush.msrb.mxu1 %v1742_v17 }
  0xff   : > { %706 = vmatpush.msrb.mxu0 %v1747_v60  ;;  %726 = vmatpush.msrb.mxu1 %v1761_v11 }
 0x101   : > { %707 = vmatpush.msrb.mxu0 %v1799_v21  ;;  %727 = vmatpush.msrb.mxu1 %v1804_v14 }
 0x103   : > { %915 = vmatpush.msra.mxu0 %v1424_v27  ;;  %935 = vmatpush.msra.mxu1 %v1429_v28 }
 0x105   : > { %916 = vmatpush.msra.mxu0 %v1434_v29  ;;  %936 = vmatpush.msra.mxu1 %v1441_v30 }
 0x107   : > { %917 = vmatpush.msra.mxu0 %v1446_v31  ;;  %937 = vmatpush.msra.mxu1 %v1451_v32 }
 0x109   : > { %918 = vmatpush.msra.mxu0 %v1465_v35  ;;  %938 = vmatpush.msra.mxu1 %v1470_v36 }
 0x10b   : > { %919 = vmatpush.msra.mxu0 %v1483_v38  ;;  %939 = vmatpush.msra.mxu1 %v1488_v39 }
 0x10d   : > { %920 = vmatpush.msra.mxu0 %v1512_v49  ;;  %940 = vmatpush.msra.mxu1 %v1517_v50 }
 0x10f   : > { %921 = vmatpush.msra.mxu0 %v1531_v56  ;;  %941 = vmatpush.msra.mxu1 %v1536_v57 }
 0x111   : > { %922 = vmatpush.msra.mxu0 %v1564_v2  ;;  %942 = vmatpush.msra.mxu1 %v1569_v3 }
 0x113   : > { %923 = vmatpush.msra.mxu0 %v1586_v8  ;;  %943 = vmatpush.msra.mxu1 %v1597_v13 }
 0x115   : > { %924 = vmatpush.msra.mxu0 %v1618_v26  ;;  %944 = vmatpush.msra.mxu1 %v1638_v47 }
 0x117   : > { %925 = vmatpush.msra.mxu0 %v1643_v48  ;;  %945 = vmatpush.msra.mxu1 %v1673_v10 }
 0x119   : > { %926 = vmatpush.msra.mxu0 %v1678_v18  ;;  %946 = vmatpush.msra.mxu1 %v1693_v43 }
 0x11b   : > { %927 = vmatpush.msra.mxu0 %v1698_v45  ;;  %947 = vmatpush.msra.mxu1 %v1714_v9 }
 0x11d   : > { %928 = vmatpush.msra.mxu0 %v1719_v12  ;;  %948 = vmatpush.msra.mxu1 %v1742_v17 }
 0x11f   : > { %929 = vmatpush.msra.mxu0 %v1747_v60  ;;  %949 = vmatpush.msra.mxu1 %v1761_v11 }
 0x121   : > { %930 = vmatpush.msra.mxu0 %v1799_v21  ;;  %950 = vmatpush.msra.mxu1 %v1804_v14 }
 0x15f   : > { %v627_v4 = vpop.f32.mrf.mxu0  ;;  %v647_v23 = vpop.f32.mrf.mxu1 }
 0x160   : > { %v690_v19 = vmul.f32 %v627_v4, %v627_v4  ;;  %v691_v54 = vmul.f32 %v647_v23, %v647_v23  ;;  %666 = vmatmul.f32.vlgmr.msra.gmra.mxu2 %v627_v4  ;;  %686 = vmatmul.f32.vlgmr.msra.gmra.mxu3 %v647_v23 }
 0x162   : > { %708 = vmatmul.f32.vlgmr.msrb.gmra.mxu0 %v690_v19  ;;  %728 = vmatmul.f32.vlgmr.msrb.gmra.mxu1 %v691_v54 }
 0x1df   : > { %v709_v20 = vpop.f32.mrf.mxu0  ;;  %v729_v25 = vpop.f32.mrf.mxu1 }
 0x1e0   : > { %v730_v24 = vadd.f32 %v729_v25, %v709_v20 }
 0x1e2   : > { %v733_v58 = vmul.f32 0.00390625, %v730_v24 }
 0x1e3   : > { %v667_v16 = vpop.f32.mrf.mxu2  ;;  %v687_v55 = vpop.f32.mrf.mxu3 }
 0x1e4   : > { %v688_v5 = vadd.f32 %v687_v55, %v667_v16 }
 0x1e6   : > { %v732_v59 = vmul.f32 0.00390625, %v688_v5 }
 0x1e8   : > { %v734_v53 = vmul.f32 %v732_v59, %v732_v59 }
 0x1ea   : > { %v735_v63 = vsub.f32 %v733_v58, %v734_v53  ;;  %v750_v53 = vld [vmem:[%s2021_s6] sm:$0xf] }
 0x1ec   : > { %v736_v46 = vmax.f32 %v735_v63, 0.0 }
 0x1ee   : > { %v738_v42 = vadd.f32 1e-05, %v736_v46 }
 0x1f0   : > { %1195 = vrsqrt.f32 %v738_v42  ;;  %vm745_vm11 = vweird.f32 %v738_v42 }
 0x1f6   : > { %v1196_v41 = vpop.eup %1195 }
 0x1f7   : > { %v740_v19 = vmul.f32 %v1196_v41, %v738_v42  ;;  %vm746_vm10 = vweird.f32 %v1196_v41 }
 0x1f8   : > { %vm747_vm12 = vmor %vm745_vm11, %vm746_vm10 }
 0x1f9   : > { %v741_v54 = vmul.f32 %v1196_v41, %v740_v19 }
 0x1fb   : > { %v742_v52 = vmul.f32 0.5, %v741_v54 }
 0x1fd   : > { %v743_v51 = vsub.f32 1.5, %v742_v52 }
 0x1ff   : > { %v744_v20 = vmul.f32 %v1196_v41, %v743_v51 }
 0x201   : > { %v748_v25 = vsel %vm747_vm12, %v1196_v41, %v744_v20 }
 0x202   : > { %v749_v16 = vmul.f32 %v748_v25, %v737_v7 }
 0x204   : > { %v751_v58 = vmul.f32 %v749_v16, %v732_v59  ;;  %755 = vperm.xlu1 %1192, %v749_v16  }
 0x206   : > { %v752_v63 = vsub.f32 %v750_v53, %v751_v58  ;;  %v2055_v58 = vperm.slane %v1551_v62, 1 }
 0x208   : > { %762 = vperm.xlu2 %1193, %v752_v63  }
 0x262   : > { %v763_v15 = vpop.permute.xlu2 %762 }
 0x276   : > { %v756_v46 = vpop.permute.xlu1 %755 }
 0x277   : > { %v758_v52 = vmul.f32 %v756_v46, %v627_v4  ;;  %v759_v55 = vmul.f32 %v756_v46, %v647_v23 }
 0x279   : > { %v765_v24 = vadd.f32 %v763_v15, %v758_v52  ;;  %v766_v5 = vadd.f32 %v763_v15, %v759_v55  ;;  %v2056_v55 = vperm.slane %v1478_v37, 0 }
 0x27b   : > { %v767_v19 = vmax.f32 %v765_v24, 0.0  ;;  %v768_v51 = vmax.f32 %v766_v5, 0.0  ;;  %v2057_v24 = vperm.slane %v1478_v37, 1  ;;  %v2060_v37 = vperm.slane %v1559_v1, 0 }
 0x27d   : > { %819 = vrot.lane.b32.xlu1 %v768_v51, %s1268_s19  ;;  %825 = vrot.lane.b32.xlu2 %v767_v19, %s1270_s24 }
 0x27e   : > { %817 = vrot.lane.b32.xlu0 %v767_v19, %s1268_s19  ;;  %s2054_s19 = smov 17  }
 0x285   : > { %801 = vrot.lane.b32.xlu1 %v767_v19, %s1266_s3  ;;  %803 = vrot.lane.b32.xlu2 %v768_v51, %s1266_s3  ;;  %s352_s3 = scalar_lea.vmem [#allocation2], %s1119_s29  ;;  %s1219_s29 = scalar_lea.hbm %s2025_s10, 16 }
 0x286   : > { %827 = vrot.lane.b32.xlu0 %v768_v51, %s1270_s24 }
 0x28d   : > { %811 = vrot.lane.b32.xlu1 %v768_v51, %s1267_s17  ;;  %793 = vrot.lane.b32.xlu2 %v767_v19, %s2051_s11 }
 0x28e   : > { %809 = vrot.lane.b32.xlu0 %v767_v19, %s1267_s17  ;;  %s1053_s17 = sshll.u32 %s352_s3, 4  ;;  %s1054_s17 = int_to_ptr.vmem [resolvable:$true] %s1053_s17 }
 0x295   : > { %777 = vrot.lane.b32.xlu1 %v767_v19, %s2052_s20  ;;  %779 = vrot.lane.b32.xlu2 %v768_v51, %s2052_s20 }
 0x296   : > { %795 = vrot.lane.b32.xlu0 %v768_v51, %s2051_s11  ;;  %s1143_s11 = sshll.u32 %s1348_s16, 3  ;;  %s1040_s16 = scalar_lea.sflag [#allocation3], %s350_s30 }
 0x29d   : > { %787 = vrot.lane.b32.xlu1 %v768_v51, %s2053_s25  ;;  %769 = vrot.lane.b32.xlu2 %v767_v19, %s2054_s19 }
 0x29e   : > { %785 = vrot.lane.b32.xlu0 %v767_v19, %s2053_s25 }
 0x2a6   : > { %771 = vrot.lane.b32.xlu0 %v768_v51, %s2054_s19  ;;  %s1051_s19 = scalar_lea.hbm %s2025_s10, %s1143_s11 }
 0x2a7   : > { %s1055_s24 = sshll.u32 %s1051_s19, 4  ;;  %s1056_s24 = int_to_ptr.hbm [resolvable:$true] %s1055_s24 }
 0x2a8   : > { %s1213_s26 = sshra.s32 %s1056_s24, 4  ;;  %s1214_s26 = int_to_ptr.hbm [resolvable:$true] %s1213_s26 }
 0x2a9   : > { %s1215_s27 = scalar_lea.hbm %s1214_s26, 8  ;;  %p1220_p0 = scmp.lt.s32.totalorder %s1214_s26, %s2025_s10 }
 0x2aa   : > { %p1216_p11 = scmp.ne.s32.totalorder %s1214_s26, %s1215_s27  ;;  %p1221_p1 = scmp.lt.s32.totalorder %s1219_s29, %s1215_s27 }
 0x2ac   : > { %p1217_p12 = pnand %p1216_p11, %p1365_p5  ;;  %p1222_p2 = por %p1221_p1, %p1220_p0 }
 0x2ae   : > { %p1218_p13 = pneg %p1217_p12 }
 0x2b0   : > { %p1223_p3 = pnand %p1222_p2, %p1218_p13 }
 0x2d7   : > { %v826_v42 = vpop.permute.xlu2 %825 }
 0x2df   : > { %v804_v20 = vpop.permute.xlu2 %803 }
 0x2ef   : > { %v820_v41 = vpop.permute.xlu1 %819 }
 0x2f0   : > { %v818_v7 = vpop.permute.xlu0 %817 }
 0x2f1   : > { %v821_v25 = vsel %vm528_vm1, %v818_v7, %v820_v41  ;;  %v822_v16 = vsel %vm528_vm1, %v820_v41, %v818_v7  ;;  %v2059_v41 = vperm.slane %v1460_v34, 1 }
 0x2f2   : > { %v823_v15 = vmul.f32 %v821_v25, %v2056_v55  ;;  %v824_v5 = vmul.f32 %v822_v16, %v2057_v24 }
 0x2f7   : > { %v802_v4 = vpop.permute.xlu1 %801 }
 0x2f8   : > { %v828_v23 = vpop.permute.xlu0 %827  ;;  %v805_v46 = vsel %vm486_vm0, %v802_v4, %v804_v20  ;;  %v806_v52 = vsel %vm486_vm0, %v804_v20, %v802_v4  ;;  %v854_v4 = vrot.slane %v824_v5, 4 }
 0x2f9   : > { %v829_v59 = vsel %vm549_vm5, %v826_v42, %v828_v23  ;;  %v830_v54 = vsel %vm549_vm5, %v828_v23, %v826_v42  ;;  %v808_v42 = vmul.f32 %v806_v52, %v2059_v41  ;;  %v2062_v41 = vperm.slane %v1503_v44, 0 }
 0x2fa   : > { %v831_v53 = vmul.f32 %v829_v59, %v555_v6  ;;  %v832_v63 = vmul.f32 %v830_v54, %v2055_v58  ;;  %v2058_v6 = vperm.slane %v1460_v34, 0  ;;  %v853_v59 = vrot.slane %v823_v15, 4  ;;  %v794_v34 = vpop.permute.xlu2 %793 }
 0x2fb   : > { %v2061_v58 = vperm.slane %v1559_v1, 1 }
 0x2fc   : > { %1133 = vmatpush.msk.msrb.mxu2 %vm590_vm6, %v831_v53  ;;  %1135 = vmatpush.msk.msrb.mxu3 %vm590_vm6, %v832_v63  ;;  %v807_v62 = vmul.f32 %v805_v46, %v2058_v6  ;;  %v848_v53 = vrot.slane %v808_v42, 4 }
 0x2fe   : > { %v847_v25 = vrot.slane %v807_v62, 4  ;;  %v862_v15 = vsel %vm590_vm6, %v768_v51, %v848_v53 }
 0x2ff   : > { %v812_v7 = vpop.permute.xlu1 %811 }
 0x300   : > { %v810_v23 = vpop.permute.xlu0 %809  ;;  %v861_v55 = vsel %vm590_vm6, %v767_v19, %v847_v25  ;;  %v2064_v25 = vperm.slane %v1656_v61, 0 }
 0x301   : > { %v813_v54 = vsel %vm507_vm3, %v810_v23, %v812_v7  ;;  %v814_v20 = vsel %vm507_vm3, %v812_v7, %v810_v23  ;;  %v2063_v7 = vperm.slane %v1503_v44, 1 }
 0x302   : > { %v815_v16 = vmul.f32 %v813_v54, %v2060_v37  ;;  %v816_v63 = vmul.f32 %v814_v20, %v2061_v58  ;;  %v780_v62 = vpop.permute.xlu2 %779  ;;  %v2065_v37 = vperm.slane %v1656_v61, 1 }
 0x304   : > { %v863_v46 = vsel %vm590_vm6, %v815_v16, %v853_v59  ;;  %v864_v52 = vsel %vm590_vm6, %v816_v63, %v854_v4 }
 0x305   : > { %887 = vmatpush.msrb.mxu2 %v863_v46  ;;  %907 = vmatpush.msrb.mxu3 %v864_v52  ;;  %v2066_v46 = vperm.slane %v1493_v40, 0 }
 0x307   : > { %888 = vmatpush.msrb.mxu2 %v861_v55  ;;  %908 = vmatpush.msrb.mxu3 %v862_v15  ;;  %v778_v24 = vpop.permute.xlu1 %777  ;;  %v2067_v55 = vperm.slane %v1493_v40, 1  ;;  %v865_v40 = vld [vmem:[%s2022_s7] sm:$0xf] }
 0x308   : > { %v796_v5 = vpop.permute.xlu0 %795  ;;  %v781_v44 = vsel %vm423_vm4, %v778_v24, %v780_v62  ;;  %v782_v58 = vsel %vm423_vm4, %v780_v62, %v778_v24 }
 0x309   : > { %v797_v6 = vsel %vm465_vm2, %v794_v34, %v796_v5  ;;  %v798_v1 = vsel %vm465_vm2, %v796_v5, %v794_v34  ;;  %v783_v52 = vmul.f32 %v782_v58, %v2066_v46  ;;  %v784_v15 = vmul.f32 %v781_v44, %v2067_v55 }
 0x30a   : > { %v799_v42 = vmul.f32 %v798_v1, %v2062_v41  ;;  %v800_v23 = vmul.f32 %v797_v6, %v2063_v7  ;;  %v770_v61 = vpop.permute.xlu2 %769  ;;  %v2068_v41 = vperm.slane %v1628_v22, 0  ;;  %v2069_v7 = vperm.slane %v1628_v22, 1 }
 0x30b   : > { %v835_v1 = vrot.slane %v783_v52, 4  ;;  %v836_v62 = vrot.slane %v784_v15, 4 }
 0x30c   : > { %v841_v54 = vrot.slane %v799_v42, 4  ;;  %v842_v20 = vrot.slane %v800_v23, 4 }
 0x30f   : > { %v788_v19 = vpop.permute.xlu1 %787 }
 0x310   : > { %v786_v59 = vpop.permute.xlu0 %785 }
 0x311   : > { %v789_v51 = vsel %vm444_vm8, %v786_v59, %v788_v19  ;;  %v790_v4 = vsel %vm444_vm8, %v788_v19, %v786_v59 }
 0x312   : > { %v791_v53 = vmul.f32 %v790_v4, %v2064_v25  ;;  %v792_v16 = vmul.f32 %v789_v51, %v2065_v37 }
 0x314   : > { %v859_v63 = vsel %vm590_vm6, %v791_v53, %v841_v54  ;;  %v860_v34 = vsel %vm590_vm6, %v792_v16, %v842_v20 }
 0x315   : > { %889 = vmatpush.msrb.mxu2 %v859_v63  ;;  %909 = vmatpush.msrb.mxu3 %v860_v34 }
 0x318   : > { %v772_v5 = vpop.permute.xlu0 %771 }
 0x319   : > { %v773_v6 = vsel %vm403_vm7, %v770_v61, %v772_v5  ;;  %v774_v24 = vsel %vm403_vm7, %v772_v5, %v770_v61 }
 0x31a   : > { %v775_v42 = vmul.f32 %v774_v24, %v2068_v41  ;;  %v776_v23 = vmul.f32 %v773_v6, %v2069_v7 }
 0x31c   : > { %v857_v19 = vsel %vm590_vm6, %v775_v42, %v835_v1  ;;  %v858_v59 = vsel %vm590_vm6, %v776_v23, %v836_v62 }
 0x31d   : > { %890 = vmatpush.msrb.mxu2 %v857_v19  ;;  %910 = vmatpush.msrb.mxu3 %v858_v59 }
 0x31e   : > { %1134 = vmatmul.msk.f32.vlgmr.msrb.gmra.mxu2 %vm600_vm9, %v865_v40  ;;  %1136 = vmatmul.msk.f32.vlgmr.msrb.gmra.mxu3 %vm600_vm9, %v865_v40 }
 0x31f   : > { %957 = vmatpush.msra.mxu2 %v1424_v27  ;;  %977 = vmatpush.msra.mxu3 %v1429_v28 }
 0x321   : > { %958 = vmatpush.msra.mxu2 %v1434_v29  ;;  %978 = vmatpush.msra.mxu3 %v1441_v30 }
 0x323   : > { %959 = vmatpush.msra.mxu2 %v1446_v31  ;;  %979 = vmatpush.msra.mxu3 %v1451_v32 }
 0x325   : > { %960 = vmatpush.msra.mxu2 %v1465_v35  ;;  %980 = vmatpush.msra.mxu3 %v1470_v36 }
 0x327   : > { %961 = vmatpush.msra.mxu2 %v1483_v38  ;;  %981 = vmatpush.msra.mxu3 %v1488_v39 }
 0x329   : > { %962 = vmatpush.msra.mxu2 %v1512_v49  ;;  %982 = vmatpush.msra.mxu3 %v1517_v50 }
 0x32b   : > { %963 = vmatpush.msra.mxu2 %v1531_v56  ;;  %983 = vmatpush.msra.mxu3 %v1536_v57 }
 0x32d   : > { %964 = vmatpush.msra.mxu2 %v1564_v2  ;;  %984 = vmatpush.msra.mxu3 %v1569_v3 }
 0x32f   : > { %965 = vmatpush.msra.mxu2 %v1586_v8  ;;  %985 = vmatpush.msra.mxu3 %v1597_v13 }
 0x331   : > { %966 = vmatpush.msra.mxu2 %v1618_v26  ;;  %986 = vmatpush.msra.mxu3 %v1638_v47  ;;  %v1002_v26 = vld [vmem:[%s2023_s8] sm:$0xf] }
 0x333   : > { %967 = vmatpush.msra.mxu2 %v1643_v48  ;;  %987 = vmatpush.msra.mxu3 %v1673_v10 }
 0x335   : > { %968 = vmatpush.msra.mxu2 %v1678_v18  ;;  %988 = vmatpush.msra.mxu3 %v1693_v43  ;;  %v1015_v18 = vld [vmem:[%s2024_s9] sm:$0xf] }
 0x337   : > { %969 = vmatpush.msra.mxu2 %v1698_v45  ;;  %989 = vmatpush.msra.mxu3 %v1714_v9 }
 0x339   : > { %970 = vmatpush.msra.mxu2 %v1719_v12  ;;  %990 = vmatpush.msra.mxu3 %v1742_v17 }
 0x33b   : > { %971 = vmatpush.msra.mxu2 %v1747_v60  ;;  %991 = vmatpush.msra.mxu3 %v1761_v11 }
 0x33d   : > { %972 = vmatpush.msra.mxu2 %v1799_v21  ;;  %992 = vmatpush.msra.mxu3 %v1804_v14 }
 0x3a1   : > { %v892_v27 = vpop.f32.mrf.mxu2  ;;  %v912_v28 = vpop.f32.mrf.mxu3 }
 0x3a2   : > { %v955_v29 = vmul.f32 %v892_v27, %v892_v27  ;;  %v956_v30 = vmul.f32 %v912_v28, %v912_v28  ;;  %931 = vmatmul.f32.vlgmr.msra.gmra.mxu0 %v892_v27  ;;  %951 = vmatmul.f32.vlgmr.msra.gmra.mxu1 %v912_v28 }
 0x3a4   : > { %973 = vmatmul.f32.vlgmr.msra.gmra.mxu2 %v955_v29  ;;  %993 = vmatmul.f32.vlgmr.msra.gmra.mxu3 %v956_v30 }
 0x41f   : > { %v932_v31 = vpop.f32.mrf.mxu0  ;;  %v952_v32 = vpop.f32.mrf.mxu1 }
 0x420   : > { %v953_v33 = vadd.f32 %v952_v32, %v932_v31 }
 0x422   : > { %v997_v35 = vmul.f32 0.00390625, %v953_v33 }
 0x424   : > { %v999_v49 = vmul.f32 %v997_v35, %v997_v35 }
 0x427   : > { %v974_v36 = vpop.f32.mrf.mxu2  ;;  %v994_v38 = vpop.f32.mrf.mxu3 }
 0x428   : > { %v995_v39 = vadd.f32 %v994_v38, %v974_v36 }
 0x42a   : > { %v998_v50 = vmul.f32 0.00390625, %v995_v39 }
 0x42c   : > { %v1000_v56 = vsub.f32 %v998_v50, %v999_v49 }
 0x42e   : > { %v1001_v57 = vmax.f32 %v1000_v56, 0.0 }
 0x430   : > { %v1003_v2 = vadd.f32 1e-05, %v1001_v57 }
 0x432   : > { %1197 = vrsqrt.f32 %v1003_v2  ;;  %vm1010_vm14 = vweird.f32 %v1003_v2 }
 0x438   : > { %v1198_v3 = vpop.eup %1197 }
 0x439   : > { %v1005_v8 = vmul.f32 %v1198_v3, %v1003_v2  ;;  %vm1011_vm13 = vweird.f32 %v1198_v3 }
 0x43a   : > { %vm1012_vm15 = vmor %vm1010_vm14, %vm1011_vm13 }
 0x43b   : > { %v1006_v9 = vmul.f32 %v1198_v3, %v1005_v8 }
 0x43d   : > { %v1007_v10 = vmul.f32 0.5, %v1006_v9 }
 0x43f   : > { %v1008_v13 = vsub.f32 1.5, %v1007_v10 }
 0x441   : > { %v1009_v22 = vmul.f32 %v1198_v3, %v1008_v13 }
 0x443   : > { %v1013_v47 = vsel %vm1012_vm15, %v1198_v3, %v1009_v22 }
 0x444   : > { %v1014_v48 = vmul.f32 %v1013_v47, %v1002_v26 }
 0x446   : > { %1020 = vperm.xlu1 %1192, %v1014_v48   ;;  %v1016_v43 = vmul.f32 %v1014_v48, %v997_v35 }
 0x448   : > { %v1017_v45 = vsub.f32 %v1015_v18, %v1016_v43 }
 0x44a   : > { %1027 = vperm.xlu2 %1193, %v1017_v45  }
 0x4a4   : > { %v1028_v11 = vpop.permute.xlu2 %1027 }
 0x4b8   : > { %v1021_v12 = vpop.permute.xlu1 %1020 }
 0x4b9   : > { %v1023_v17 = vmul.f32 %v1021_v12, %v892_v27  ;;  %v1024_v60 = vmul.f32 %v1021_v12, %v912_v28 }
 0x4bb   : > { %v1031_v21 = vadd.f32 %v1028_v11, %v1024_v60  ;;  %v1030_v14 = vadd.f32 %v1028_v11, %v1023_v17 }
 0x4bd   : > { %v1034_v51 = vrot.slane %v1031_v21, 4 }
 0x4bf   : > { %v1035_v4 = vsel %vm590_vm6, %v1030_v14, %v1034_v51 }
 0x4c0   : > { %v1037_v54 = vadd.f32 %v1035_v4, %v1380_v0 }
 0x4c2   : > { %1038 = vst [vmem:[%s352_s3] sm:$0xff] %v1037_v54 }
 0x4c3   : > { %1226 = shalt.err (!%p1223_p3)
}
 0x4c4   : > { %1144 = dma.vmem_to_hbm [thread:$0]  (%p1365_p5), %s1054_s17, 128, %s1056_s24, %s1040_s16  }
 0x4c5 PF: > { %p1150_p4 = scmp.ge.s32.totalorder %s1261_s15, 2  ;;  %s1067_s30 = sand.u32 1, %s1249_s12  }
 0x4c6   : > { %s1068_s19 = scalar_lea.sflag [#allocation3], %s1067_s30 }
 0x4c7   : > { %p1147_p7 = pnand %p1150_p4, %p1369_p6 }
 0x4c9   : > { %p1148_p8 = pneg %p1147_p7 }
 0x4cb   : > { %1244 = dma.done.wait (%p1148_p8), %s1068_s19, 128  }
 0x4cc   : > { %1246 = vsyncadd (%p1148_p8), %s1068_s19, 4294967168  ;;  %p20_p9 = scmp.ge.s32.totalorder %s1352_s18, 4   ;;  %s2070_s12 = smov %s1253_s13 }
 0x4cd   : > { %s2071_s13 = smov %s1257_s14  ;;  %s2072_s14 = smov %s1363_s21 }
 0x4ce   : > { %s2073_s15 = smov %s1352_s18  ;;  %22 = sbr.rel (!%p20_p9) target bundleno = 3 (0x3), region = 102 }
 0x4d3   :  { %1074 = vsyncpa [#allocation3], 1 }
 0x4d4   :  { %1076 = vsyncpa [#allocation3 + $0x1], 1 }

</bundles_post_ra>
